<compile_context>
chip_gen: v6e
topology: v6e:2x2x1
jax: 0.10.0
libtpu: 0.0.40
codegen_flags: <defaults>
</compile_context>

<pallas_src>
import numpy as np
import jax
import jax.numpy as jnp
from jax.experimental import pallas as pl
from jax.experimental.pallas import tpu as pltpu


def critic_kernel(x_ref, a_ref,
                  w1_ref, b1_ref,
                  w2h_ref, w2a_ref, b2_ref,
                  w3r_ref, b3_ref,
                  out_ref):
    # fc1 + relu (MXU, f32 accumulation)
    h1 = jnp.dot(x_ref[...], w1_ref[...], preferred_element_type=jnp.float32)
    h1 = jnp.maximum(h1 + b1_ref[...], 0.0)

    # fc2 over concat([h1, a]) expressed as a split matmul, + relu
    h1c = h1.astype(w2h_ref.dtype)          # bf16 feed when compute dtype is bf16
    h2 = (jnp.dot(h1c, w2h_ref[...], preferred_element_type=jnp.float32)
          + jnp.dot(a_ref[...], w2a_ref[...], preferred_element_type=jnp.float32)
          + b2_ref[...])
    h2 = jnp.maximum(h2, 0.0)

    # fc3 (scalar head, N=1): VPU elementwise mul + XLU lane reduce instead of
    # an MXU pass that would use 1 of 128 result lanes.
    w3_row = w3r_ref[...].astype(jnp.float32)            # (1, hidden2)
    out_ref[...] = (jnp.sum(h2 * w3_row, axis=-1, keepdims=True)
                    + b3_ref[...]).astype(out_ref.dtype)


def _round_up(n, m):
    return ((n + m - 1) // m) * m


def critic_forward(x, a, params, *, block_b=256, compute_dtype=jnp.float32):
    """x: (B, nb_states), a: (B, nb_actions) -> (B, 1) Q-values (float32)."""
    (w1, b1, w2h, w2a, b2, w3, b3) = params
    B, nb_states = x.shape
    nb_actions = a.shape[1]
    hidden1 = w1.shape[1]
    hidden2 = w2h.shape[1]

    cd = jnp.dtype(compute_dtype)
    # Matmul operands in the compute dtype (bf16 recommended on v6e/v7x);
    # biases and accumulation stay f32.
    x_c = x.astype(cd)
    a_c = a.astype(cd)
    w1_c = w1.astype(cd)
    w2h_c = w2h.astype(cd)
    w2a_c = w2a.astype(cd)
    w3_row = w3.reshape(1, hidden2).astype(cd)
    b1_c = b1.astype(jnp.float32)
    b2_c = b2.astype(jnp.float32)
    b3_c = b3.astype(jnp.float32)

    # Batch tile: multiple of 8 sublanes, capped at block_b. Pad B up to a
    # multiple of the tile so every grid step sees a full block.
    tb = block_b if B >= block_b else _round_up(B, 8)
    B_pad = _round_up(B, tb)
    if B_pad != B:
        pad = B_pad - B
        x_c = jnp.pad(x_c, ((0, pad), (0, 0)))
        a_c = jnp.pad(a_c, ((0, pad), (0, 0)))
    grid = (B_pad // tb,)

    # Batch-tiled specs for activations, constant (VMEM-resident) specs for
    # weights/biases.
    def batch_spec(ncols):
        return pl.BlockSpec((tb, ncols), lambda i: (i, 0))

    def resident(arr):
        return pl.BlockSpec(arr.shape, lambda i: (0, 0))

    flops = 2 * B_pad * (nb_states * hidden1
                         + (hidden1 + nb_actions) * hidden2
                         + hidden2)
    weight_bytes = sum(int(w.size) * w.dtype.itemsize
                       for w in (w1_c, w2h_c, w2a_c, w3_row, b1_c, b2_c, b3_c))
    bytes_accessed = (int(x_c.size) * x_c.dtype.itemsize
                      + int(a_c.size) * a_c.dtype.itemsize
                      + weight_bytes
                      + B_pad * 4)

    out = pl.pallas_call(
        critic_kernel,
        out_shape=jax.ShapeDtypeStruct((B_pad, 1), jnp.float32),
        grid=grid,
        in_specs=[batch_spec(nb_states), batch_spec(nb_actions),
                  resident(w1_c), resident(b1_c),
                  resident(w2h_c), resident(w2a_c), resident(b2_c),
                  resident(w3_row), resident(b3_c)],
        out_specs=pl.BlockSpec((tb, 1), lambda i: (i, 0)),
        compiler_params=pltpu.CompilerParams(
            dimension_semantics=("parallel",)),
        cost_estimate=pl.CostEstimate(flops=flops, transcendentals=0,
                                      bytes_accessed=bytes_accessed),
    )(x_c, a_c, w1_c, b1_c, w2h_c, w2a_c, b2_c, w3_row, b3_c)

    return out[:B]


def init_critic_params(key, nb_states, nb_actions, hidden1, hidden2, init_w=0.003):
    """Deterministic re-implementation of Critic.__init__ / init_weights.

    PyTorch nn.Linear stores weight as (out, in); fanin_init uses size[0]
    (= out_features) as fanin, matching the reference code.  Biases keep the
    default nn.Linear init: U(-1/sqrt(in_features), 1/sqrt(in_features)).
    We return weights already transposed to (in, out).
    """
    ks = jax.random.split(key, 6)

    def uniform(k, shape, bound):
        return jax.random.uniform(k, shape, jnp.float32, -bound, bound)

    # fc1: weight (hidden1, nb_states), fanin_init fanin = hidden1
    w1 = uniform(ks[0], (hidden1, nb_states), 1.0 / np.sqrt(hidden1)).T
    b1 = uniform(ks[1], (1, hidden1), 1.0 / np.sqrt(nb_states))

    # fc2: weight (hidden2, hidden1 + nb_actions), fanin_init fanin = hidden2
    w2 = uniform(ks[2], (hidden2, hidden1 + nb_actions), 1.0 / np.sqrt(hidden2)).T
    b2 = uniform(ks[3], (1, hidden2), 1.0 / np.sqrt(hidden1 + nb_actions))
    w2h, w2a = w2[:hidden1, :], w2[hidden1:, :]

    # fc3: weight (1, hidden2) ~ U(-init_w, init_w)
    w3 = uniform(ks[4], (1, hidden2), init_w).T          # (hidden2, 1)
    b3 = uniform(ks[5], (1, 1), 1.0 / np.sqrt(hidden2))

    return (jnp.asarray(w1), b1, jnp.asarray(w2h), jnp.asarray(w2a), b2,
            jnp.asarray(w3), b3)


def critic_reference(x, a, params):
    """Pure-JAX reference mirroring the PyTorch forward."""
    (w1, b1, w2h, w2a, b2, w3, b3) = params
    h1 = jnp.maximum(x @ w1 + b1, 0.0)
    cat = jnp.concatenate([h1, a], axis=1)
    w2 = jnp.concatenate([w2h, w2a], axis=0)
    h2 = jnp.maximum(cat @ w2 + b2, 0.0)
    return h2 @ w3 + b3


if __name__ == "__main__":
    # Small shapes consistent with the module's forward.
    batch, nb_states, nb_actions = 2, 32, 16
    hidden1, hidden2 = 128, 128

    key = jax.random.PRNGKey(0)
    k_params, k_x, k_a, k_x2, k_a2 = jax.random.split(key, 5)

    params = init_critic_params(k_params, nb_states, nb_actions, hidden1, hidden2)
    x = jax.random.normal(k_x, (batch, nb_states), jnp.float32)
    a = jax.random.normal(k_a, (batch, nb_actions), jnp.float32)

    # f32 path (tiny batch -> padded to 8 rows, single grid step)
    out = jax.block_until_ready(critic_forward(x, a, params))
    ref = critic_reference(x, a, params)
    assert out.shape == (batch, 1), out.shape
    np.testing.assert_allclose(np.asarray(out), np.asarray(ref),
                               rtol=1e-5, atol=1e-5)

    # Larger, non-aligned batch exercising the multi-step tiled grid + padding.
    big_b = 300
    xb = jax.random.normal(k_x2, (big_b, nb_states), jnp.float32)
    ab = jax.random.normal(k_a2, (big_b, nb_actions), jnp.float32)
    out_big = jax.block_until_ready(
        critic_forward(xb, ab, params, block_b=128))
    ref_big = critic_reference(xb, ab, params)
    np.testing.assert_allclose(np.asarray(out_big), np.asarray(ref_big),
                               rtol=1e-5, atol=1e-5)

    # bf16 compute path (recommended on v6e/v7x), f32 accumulation -> loose tol.
    out_bf16 = jax.block_until_ready(
        critic_forward(xb, ab, params, block_b=128, compute_dtype=jnp.bfloat16))
    np.testing.assert_allclose(np.asarray(out_bf16), np.asarray(ref_big),
                               rtol=2e-2, atol=2e-2)

    print("KERNEL_OK")
</pallas_src>

<mosaic_0001>
module attributes {stable_mosaic.version = 11 : i64} {
  func.func @critic_kernel(%arg0: i32, %arg1: memref<8x32xf32, #tpu.memory_space<vmem>>, %arg2: memref<8x16xf32, #tpu.memory_space<vmem>>, %arg3: memref<32x128xf32, #tpu.memory_space<vmem>>, %arg4: memref<1x128xf32, #tpu.memory_space<vmem>>, %arg5: memref<128x128xf32, #tpu.memory_space<vmem>>, %arg6: memref<16x128xf32, #tpu.memory_space<vmem>>, %arg7: memref<1x128xf32, #tpu.memory_space<vmem>>, %arg8: memref<1x128xf32, #tpu.memory_space<vmem>>, %arg9: memref<1x1xf32, #tpu.memory_space<vmem>>, %arg10: memref<8x1xf32, #tpu.memory_space<vmem>>) attributes {dimension_semantics = [#tpu.dimension_semantics<parallel>], iteration_bounds = array<i64: 1>, scalar_prefetch = 0 : i64, scratch_operands = 0 : i64, tpu.core_type = #tpu.core_type<tc>, window_params = [{transform_indices = @transform_0, window_bounds = array<i64: 8, 32>}, {transform_indices = @transform_1, window_bounds = array<i64: 8, 16>}, {pipeline_mode = #tpu.pipeline_mode<synchronous>, transform_indices = @transform_2, window_bounds = array<i64: 32, 128>}, {pipeline_mode = #tpu.pipeline_mode<synchronous>, transform_indices = @transform_3, window_bounds = array<i64: 1, 128>}, {pipeline_mode = #tpu.pipeline_mode<synchronous>, transform_indices = @transform_4, window_bounds = array<i64: 128, 128>}, {pipeline_mode = #tpu.pipeline_mode<synchronous>, transform_indices = @transform_5, window_bounds = array<i64: 16, 128>}, {pipeline_mode = #tpu.pipeline_mode<synchronous>, transform_indices = @transform_6, window_bounds = array<i64: 1, 128>}, {pipeline_mode = #tpu.pipeline_mode<synchronous>, transform_indices = @transform_7, window_bounds = array<i64: 1, 128>}, {pipeline_mode = #tpu.pipeline_mode<synchronous>, transform_indices = @transform_8, window_bounds = array<i64: 1, 1>}, {transform_indices = @transform_9, window_bounds = array<i64: 8, 1>}]} {
    %c0 = arith.constant 0 : index
    %c0_0 = arith.constant 0 : index
    %0 = vector.load %arg1[%c0, %c0_0] : memref<8x32xf32, #tpu.memory_space<vmem>>, vector<8x32xf32>
    %c0_1 = arith.constant 0 : index
    %c0_2 = arith.constant 0 : index
    %1 = vector.load %arg3[%c0_1, %c0_2] : memref<32x128xf32, #tpu.memory_space<vmem>>, vector<32x128xf32>
    %cst = arith.constant dense<0.000000e+00> : vector<8x128xf32>
    %2 = tpu.matmul %0, %1, %cst {dimension_numbers = #tpu.dot_dimension_numbers<[1], [0], [0], [1], [0, 0, 1, 1], [], []>} : vector<8x32xf32>, vector<32x128xf32>, vector<8x128xf32> -> vector<8x128xf32>
    %c0_3 = arith.constant 0 : index
    %c0_4 = arith.constant 0 : index
    %3 = vector.load %arg4[%c0_3, %c0_4] : memref<1x128xf32, #tpu.memory_space<vmem>>, vector<1x128xf32>
    %4 = vector.broadcast %3 : vector<1x128xf32> to vector<8x128xf32>
    %5 = arith.addf %2, %4 : vector<8x128xf32>
    %cst_5 = arith.constant 0.000000e+00 : f32
    %6 = vector.broadcast %cst_5 : f32 to vector<8x128xf32>
    %7 = arith.maximumf %5, %6 : vector<8x128xf32>
    %c0_6 = arith.constant 0 : index
    %c0_7 = arith.constant 0 : index
    %8 = vector.load %arg5[%c0_6, %c0_7] : memref<128x128xf32, #tpu.memory_space<vmem>>, vector<128x128xf32>
    %cst_8 = arith.constant dense<0.000000e+00> : vector<8x128xf32>
    %9 = tpu.matmul %7, %8, %cst_8 {dimension_numbers = #tpu.dot_dimension_numbers<[1], [0], [0], [1], [0, 0, 1, 1], [], []>} : vector<8x128xf32>, vector<128x128xf32>, vector<8x128xf32> -> vector<8x128xf32>
    %c0_9 = arith.constant 0 : index
    %c0_10 = arith.constant 0 : index
    %10 = vector.load %arg2[%c0_9, %c0_10] : memref<8x16xf32, #tpu.memory_space<vmem>>, vector<8x16xf32>
    %c0_11 = arith.constant 0 : index
    %c0_12 = arith.constant 0 : index
    %11 = vector.load %arg6[%c0_11, %c0_12] : memref<16x128xf32, #tpu.memory_space<vmem>>, vector<16x128xf32>
    %cst_13 = arith.constant dense<0.000000e+00> : vector<8x128xf32>
    %12 = tpu.matmul %10, %11, %cst_13 {dimension_numbers = #tpu.dot_dimension_numbers<[1], [0], [0], [1], [0, 0, 1, 1], [], []>} : vector<8x16xf32>, vector<16x128xf32>, vector<8x128xf32> -> vector<8x128xf32>
    %13 = arith.addf %9, %12 : vector<8x128xf32>
    %c0_14 = arith.constant 0 : index
    %c0_15 = arith.constant 0 : index
    %14 = vector.load %arg7[%c0_14, %c0_15] : memref<1x128xf32, #tpu.memory_space<vmem>>, vector<1x128xf32>
    %15 = vector.broadcast %14 : vector<1x128xf32> to vector<8x128xf32>
    %16 = arith.addf %13, %15 : vector<8x128xf32>
    %cst_16 = arith.constant 0.000000e+00 : f32
    %17 = vector.broadcast %cst_16 : f32 to vector<8x128xf32>
    %18 = arith.maximumf %16, %17 : vector<8x128xf32>
    %c0_17 = arith.constant 0 : index
    %c0_18 = arith.constant 0 : index
    %19 = vector.load %arg8[%c0_17, %c0_18] : memref<1x128xf32, #tpu.memory_space<vmem>>, vector<1x128xf32>
    %20 = vector.broadcast %19 : vector<1x128xf32> to vector<8x128xf32>
    %21 = arith.mulf %18, %20 : vector<8x128xf32>
    %cst_19 = arith.constant dense<0.000000e+00> : vector<8xf32>
    %22 = vector.multi_reduction <add>, %21, %cst_19 [1] : vector<8x128xf32> to vector<8xf32>
    %23 = vector.shape_cast %22 : vector<8xf32> to vector<8x1xf32>
    %c0_20 = arith.constant 0 : index
    %c0_21 = arith.constant 0 : index
    %24 = vector.load %arg9[%c0_20, %c0_21] : memref<1x1xf32, #tpu.memory_space<vmem>>, vector<1x1xf32>
    %25 = vector.broadcast %24 : vector<1x1xf32> to vector<8x1xf32>
    %26 = arith.addf %23, %25 : vector<8x1xf32>
    %c0_22 = arith.constant 0 : index
    %c0_23 = arith.constant 0 : index
    %27 = vector.load %arg10[%c0_22, %c0_23] : memref<8x1xf32, #tpu.memory_space<vmem>>, vector<8x1xf32>
    tpu.vector_store %arg10[%c0_22, %c0_23], %26 {strides = array<i32>} : memref<8x1xf32, #tpu.memory_space<vmem>>, vector<8x1xf32>,
    return
  }
  func.func @transform_0(%arg0: i32) -> (i32, i32) {
    %c0_i32 = arith.constant 0 : i32
    %c0_i32_0 = arith.constant 0 : i32
    return %arg0, %c0_i32 : i32, i32
  }
  func.func @transform_1(%arg0: i32) -> (i32, i32) {
    %c0_i32 = arith.constant 0 : i32
    %c0_i32_0 = arith.constant 0 : i32
    return %arg0, %c0_i32 : i32, i32
  }
  func.func @transform_2(%arg0: i32) -> (i32, i32) {
    %c0_i32 = arith.constant 0 : i32
    %c0_i32_0 = arith.constant 0 : i32
    %c0_i32_1 = arith.constant 0 : i32
    return %c0_i32, %c0_i32_0 : i32, i32
  }
  func.func @transform_3(%arg0: i32) -> (i32, i32) {
    %c0_i32 = arith.constant 0 : i32
    %c0_i32_0 = arith.constant 0 : i32
    %c0_i32_1 = arith.constant 0 : i32
    return %c0_i32, %c0_i32_0 : i32, i32
  }
  func.func @transform_4(%arg0: i32) -> (i32, i32) {
    %c0_i32 = arith.constant 0 : i32
    %c0_i32_0 = arith.constant 0 : i32
    %c0_i32_1 = arith.constant 0 : i32
    return %c0_i32, %c0_i32_0 : i32, i32
  }
  func.func @transform_5(%arg0: i32) -> (i32, i32) {
    %c0_i32 = arith.constant 0 : i32
    %c0_i32_0 = arith.constant 0 : i32
    %c0_i32_1 = arith.constant 0 : i32
    return %c0_i32, %c0_i32_0 : i32, i32
  }
  func.func @transform_6(%arg0: i32) -> (i32, i32) {
    %c0_i32 = arith.constant 0 : i32
    %c0_i32_0 = arith.constant 0 : i32
    %c0_i32_1 = arith.constant 0 : i32
    return %c0_i32, %c0_i32_0 : i32, i32
  }
  func.func @transform_7(%arg0: i32) -> (i32, i32) {
    %c0_i32 = arith.constant 0 : i32
    %c0_i32_0 = arith.constant 0 : i32
    %c0_i32_1 = arith.constant 0 : i32
    return %c0_i32, %c0_i32_0 : i32, i32
  }
  func.func @transform_8(%arg0: i32) -> (i32, i32) {
    %c0_i32 = arith.constant 0 : i32
    %c0_i32_0 = arith.constant 0 : i32
    %c0_i32_1 = arith.constant 0 : i32
    return %c0_i32, %c0_i32_0 : i32, i32
  }
  func.func @transform_9(%arg0: i32) -> (i32, i32) {
    %c0_i32 = arith.constant 0 : i32
    %c0_i32_0 = arith.constant 0 : i32
    return %arg0, %c0_i32 : i32, i32
  }
}

</mosaic_0001>

<bundles_post_ra>
// kernel: tpu_custom_call.1
= control target key start
LH: loop header
LB: loop body
LE: loop exit
PB: predicated region body
PF: predicated region fallthrough
CT: control target
= control target key end

     0   :  { %s709_s0 = inlined_call_operand.hbm [shape: f32[8,32], index: 0, kind: input, shape index: {}]   ;;  %s710_s1 = inlined_call_operand.hbm [shape: f32[8,16], index: 1, kind: input, shape index: {}]   ;;  %s711_s2 = inlined_call_operand.hbm [shape: f32[32,128], index: 2, kind: input, shape index: {}]   ;;  %s712_s3 = inlined_call_operand.vmem [shape: f32[1,128], index: 3, kind: input, shape index: {}]   ;;  %s713_s4 = inlined_call_operand.hbm [shape: f32[128,128], index: 4, kind: input, shape index: {}]   ;;  %s714_s5 = inlined_call_operand.hbm [shape: f32[16,128], index: 5, kind: input, shape index: {}]   ;;  %s715_s6 = inlined_call_operand.vmem [shape: f32[1,128], index: 6, kind: input, shape index: {}]   ;;  %s716_s7 = inlined_call_operand.vmem [shape: f32[1,128], index: 7, kind: input, shape index: {}]   ;;  %s717_s8 = inlined_call_operand.<no memory space> [shape: f32[1,1], index: 8, kind: input, shape index: {}]   ;;  %s718_s9 = inlined_call_operand.vmem [shape: f32[8,1], index: 9, kind: output, shape index: {}]  }
   0x1   :  { %v14_v0 = vstv %s717_s8 }
   0x2   :  { %15 = vst [vmem:[#allocation2] sm:$0x1] %v14_v0 }
   0x3   :  { %16 = vsyncpa [#allocation4], 0 }
   0x4   :  { %17 = vsyncpa [#allocation6], 0 }
   0x5   :  { %18 = vsyncpa [#allocation9], 0  ;;  %s583_s11 = smov [#allocation5]  }
   0x6   :  { %s35_s12 = sshll.u32 %s583_s11, 4  ;;  %s36_s12 = int_to_ptr.vmem [resolvable:$true] %s35_s12 }
   0x7   :  { %s485_s13 = scalar_lea.vmem %s36_s12, 128  ;;  %p490_p1 = scmp.lt.s32.totalorder %s36_s12, %s36_s12 }
   0x8   :  { %p486_p0 = scmp.ne.s32.totalorder %s36_s12, %s485_s13  ;;  %p491_p2 = scmp.lt.s32.totalorder %s485_s13, %s485_s13 }
   0xa   :  { %p492_p3 = por %p491_p2, %p490_p1 }
   0xc   :  { %p493_p4 = pnand %p492_p3, %p486_p0 }
   0xe   :  { %496 = shalt.err (!%p493_p4)
}
   0xf   :  { %38 = dma.hbm_to_vmem [thread:$0]  %s710_s1, 128, %s36_s12, [#allocation6]  }
  0x10   :  { %s584_s16 = smov [#allocation8]   ;;  %s585_s17 = smov [#allocation3]  }
  0x11   :  { %s58_s8 = sshll.u32 %s584_s16, 4  ;;  %s25_s18 = sshll.u32 %s585_s17, 4  ;;  %s59_s8 = int_to_ptr.vmem [resolvable:$true] %s58_s8  ;;  %s26_s18 = int_to_ptr.vmem [resolvable:$true] %s25_s18 }
  0x12   :  { %s505_s19 = scalar_lea.vmem %s59_s8, 2048  ;;  %p510_p6 = scmp.lt.s32.totalorder %s59_s8, %s59_s8 }
  0x13   :  { %p506_p5 = scmp.ne.s32.totalorder %s59_s8, %s505_s19  ;;  %p511_p7 = scmp.lt.s32.totalorder %s505_s19, %s505_s19 }
  0x15   :  { %p512_p8 = por %p511_p7, %p510_p6 }
  0x17   :  { %p513_p9 = pnand %p512_p8, %p506_p5 }
  0x19   :  { %516 = shalt.err (!%p513_p9)
}
  0x1a   :  { %s586_s20 = smov 128   ;;  %s587_s21 = smov 8  }
  0x1b   :  { %64 = dma.hbm_to_vmem [thread:$0]  %s713_s4, 2048, %s59_s8, [#allocation9], %s586_s20, %s586_s20, %s587_s21  }
  0x1c   :  { %s525_s1 = scalar_lea.vmem %s26_s18, 128  ;;  %p530_p11 = scmp.lt.s32.totalorder %s26_s18, %s26_s18 }
  0x1d   :  { %p526_p10 = scmp.ne.s32.totalorder %s26_s18, %s525_s1  ;;  %p531_p12 = scmp.lt.s32.totalorder %s525_s1, %s525_s1 }
  0x1f   :  { %p532_p13 = por %p531_p12, %p530_p11 }
  0x21   :  { %p533_p0 = pnand %p532_p13, %p526_p10 }
  0x23   :  { %536 = shalt.err (!%p533_p0)
}
  0x24   :  { %28 = dma.hbm_to_vmem [thread:$0]  %s709_s0, 128, %s26_s18, [#allocation4]  }
  0x25   :  { %s588_s26 = smov [#allocation7]   ;;  %s589_s28 = smov [#allocation10]  }
  0x26   :  { %s44_s27 = sshll.u32 %s588_s26, 4  ;;  %s70_s29 = sshll.u32 %s589_s28, 4  ;;  %s45_s27 = int_to_ptr.vmem [resolvable:$true] %s44_s27  ;;  %s71_s29 = int_to_ptr.vmem [resolvable:$true] %s70_s29 }
  0x27   :  { %s545_s30 = scalar_lea.vmem %s45_s27, 512  ;;  %p550_p2 = scmp.lt.s32.totalorder %s45_s27, %s45_s27 }
  0x28   :  { %p546_p1 = scmp.ne.s32.totalorder %s45_s27, %s545_s30  ;;  %p551_p3 = scmp.lt.s32.totalorder %s545_s30, %s545_s30 }
  0x2a   :  { %p552_p4 = por %p551_p3, %p550_p2 }
  0x2c   :  { %p553_p5 = pnand %p552_p4, %p546_p1 }
  0x2e   :  { %556 = shalt.err (!%p553_p5)
}
  0x2f   :  { %50 = dma.hbm_to_vmem [thread:$0]  %s711_s2, 512, %s45_s27, [#allocation6], %s586_s20, %s586_s20, %s587_s21  }
  0x30   :  { %s565_s0 = scalar_lea.vmem %s71_s29, 256  ;;  %p570_p7 = scmp.lt.s32.totalorder %s71_s29, %s71_s29 }
  0x31   :  { %p566_p6 = scmp.ne.s32.totalorder %s71_s29, %s565_s0  ;;  %p571_p8 = scmp.lt.s32.totalorder %s565_s0, %s565_s0 }
  0x33   :  { %p572_p9 = por %p571_p8, %p570_p7 }
  0x35   :  { %p573_p10 = pnand %p572_p9, %p566_p6 }
  0x37   :  { %576 = shalt.err (!%p573_p10)
}
  0x38   :  { %76 = dma.hbm_to_vmem [thread:$0]  %s714_s5, 256, %s71_s29, [#allocation9], %s586_s20, %s586_s20, %s587_s21  }
  0x39   :  { %577 = dma.done.wait [#allocation4], 128  }
  0x3a   :  { %578 = vsyncadd [#allocation4], 4294967168 }
  0x3b   :  { %579 = dma.done.wait [#allocation6], 640  }
  0x3c   :  { %580 = vsyncadd [#allocation6], 4294966656 }
  0x3d   :  { %581 = dma.done.wait [#allocation9], 2304  }
  0x3e   :  { %582 = vsyncadd [#allocation9], 4294964992  ;;  %v590_v1 = vmov 0.0   ;;  %vm591_vm0 = vmmov 0   ;;  %v102_v2 = vld [vmem:[#allocation7 + $0x18] sm:$0xff]  ;;  %v101_v3 = vld [vmem:[#allocation7 + $0x10] sm:$0xff] }
  0x3f   :  { %415 = vmatprep.subr.mxu0 %v590_v1  ;;  %423 = vmatprep.mubr.msk.f32.mxu0 %vm591_vm0, %v590_v1  ;;  %v200_v4 = vld [vmem:[#allocation8 + $0x78] sm:$0xff]  ;;  %v100_v5 = vld [vmem:[#allocation7 + $0x8] sm:$0xff]  ;;  %v199_v6 = vld [vmem:[#allocation8 + $0x70] sm:$0xff]  ;;  %vm110_vm1 = vcmask 261120   ;;  %vm204_vm2 = vcmask 130048   ;;  %vm375_vm3 = vcmask 7168  }
  0x40   :  { %433 = vmatprep.subr.mxu1 %v590_v1  ;;  %465 = vmatprep.mubr.msk.f32.mxu1 %vm591_vm0, %v590_v1  ;;  %v198_v7 = vld [vmem:[#allocation8 + $0x68] sm:$0xff]  ;;  %v99_v8 = vld [vmem:[#allocation7] sm:$0xff]  ;;  %v98_v9 = vld [vmem:[#allocation3] sm:$0xff] }
  0x41   :  { %416 = vmatpush3.msra.mxu0 %v102_v2  ;;  %434 = vmatpush3.msra.mxu1 %v200_v4  ;;  %v197_v10 = vld [vmem:[#allocation8 + $0x60] sm:$0xff]  ;;  %v196_v11 = vld [vmem:[#allocation8 + $0x58] sm:$0xff]  ;;  %v195_v12 = vld [vmem:[#allocation8 + $0x50] sm:$0xff] }
  0x42   :  { %417 = vmatprep.subr.mxu0 %v590_v1  ;;  %435 = vmatprep.subr.mxu1 %v590_v1  ;;  %v194_v13 = vld [vmem:[#allocation8 + $0x48] sm:$0xff]  ;;  %v193_v14 = vld [vmem:[#allocation8 + $0x40] sm:$0xff]  ;;  %v192_v15 = vld [vmem:[#allocation8 + $0x38] sm:$0xff] }
  0x43   :  { %418 = vmatpush3.msra.mxu0 %v101_v3  ;;  %436 = vmatpush3.msra.mxu1 %v199_v6  ;;  %v191_v16 = vld [vmem:[#allocation8 + $0x30] sm:$0xff]  ;;  %v190_v17 = vld [vmem:[#allocation8 + $0x28] sm:$0xff]  ;;  %v189_v18 = vld [vmem:[#allocation8 + $0x20] sm:$0xff] }
  0x44   :  { %419 = vmatprep.subr.mxu0 %v590_v1  ;;  %437 = vmatprep.subr.mxu1 %v590_v1  ;;  %v188_v19 = vld [vmem:[#allocation8 + $0x18] sm:$0xff]  ;;  %v203_v20 = vld [vmem:[#allocation10 + $0x8] sm:$0xff]  ;;  %v187_v21 = vld [vmem:[#allocation8 + $0x10] sm:$0xff] }
  0x45   :  { %420 = vmatpush3.msra.mxu0 %v100_v5  ;;  %438 = vmatpush3.msra.mxu1 %v198_v7  ;;  %v202_v22 = vld [vmem:[#allocation10] sm:$0xff]  ;;  %v186_v23 = vld [vmem:[#allocation8 + $0x8] sm:$0xff]  ;;  %v201_v24 = vld [vmem:[#allocation5] sm:$0xff] }
  0x46   :  { %421 = vmatprep.subr.mxu0 %v590_v1  ;;  %439 = vmatprep.subr.mxu1 %v590_v1  ;;  %v185_v25 = vld [vmem:[#allocation8] sm:$0xff]  ;;  %v384_v26 = vld [vmem:[%s712_s3] ss:$0 sm:$0xff] }
  0x47   :  { %422 = vmatpush3.msra.mxu0 %v99_v8  ;;  %440 = vmatpush3.msra.mxu1 %v197_v10  ;;  %v387_v34 = vld [vmem:[%s715_s6] ss:$0 sm:$0xff] }
  0x48   :  { %424 = vmatmul.mubr.msk.f32.vlgmr.msra.gmra.mxu0 %vm110_vm1, %v98_v9  ;;  %441 = vmatprep.subr.mxu1 %v590_v1  ;;  %v388_v38 = vld [vmem:[%s716_s7] ss:$0 sm:$0xff] }
  0x49   :  { %426 = vmatprep.subr.mxu0 %v590_v1  ;;  %442 = vmatpush3.msra.mxu1 %v196_v11  ;;  %v389_v41 = vld [vmem:[#allocation2] ss:$0 sm:$0xff] }
  0x4a   :  { %430 = vmatprep.mubr.msk.f32.mxu0 %vm591_vm0, %v590_v1  ;;  %443 = vmatprep.subr.mxu1 %v590_v1 }
  0x4b   :  { %444 = vmatpush3.msra.mxu1 %v195_v12  ;;  %427 = vmatpush3.msra.mxu0 %v203_v20 }
  0x4c   :  { %445 = vmatprep.subr.mxu1 %v590_v1  ;;  %428 = vmatprep.subr.mxu0 %v590_v1 }
  0x4d   :  { %446 = vmatpush3.msra.mxu1 %v194_v13  ;;  %429 = vmatpush3.msra.mxu0 %v202_v22 }
  0x4e   :  { %447 = vmatprep.subr.mxu1 %v590_v1  ;;  %431 = vmatmul.mubr.msk.f32.vlgmr.msra.gmra.mxu0 %vm204_vm2, %v201_v24 }
  0x4f   :  { %448 = vmatpush3.msra.mxu1 %v193_v14 }
  0x50   :  { %449 = vmatprep.subr.mxu1 %v590_v1 }
  0x51   :  { %450 = vmatpush3.msra.mxu1 %v192_v15 }
  0x52   :  { %451 = vmatprep.subr.mxu1 %v590_v1 }
  0x53   :  { %452 = vmatpush3.msra.mxu1 %v191_v16 }
  0x54   :  { %453 = vmatprep.subr.mxu1 %v590_v1 }
  0x55   :  { %454 = vmatpush3.msra.mxu1 %v190_v17 }
  0x56   :  { %455 = vmatprep.subr.mxu1 %v590_v1 }
  0x57   :  { %456 = vmatpush3.msra.mxu1 %v189_v18 }
  0x58   :  { %457 = vmatprep.subr.mxu1 %v590_v1 }
  0x59   :  { %458 = vmatpush3.msra.mxu1 %v188_v19 }
  0x5a   :  { %459 = vmatprep.subr.mxu1 %v590_v1 }
  0x5b   :  { %460 = vmatpush3.msra.mxu1 %v187_v21 }
  0x5c   :  { %461 = vmatprep.subr.mxu1 %v590_v1 }
  0x5d   :  { %462 = vmatpush3.msra.mxu1 %v186_v23 }
  0x5e   :  { %463 = vmatprep.subr.mxu1 %v590_v1 }
  0x5f   :  { %464 = vmatpush3.msra.mxu1 %v185_v25 }
 0x108   :  { %v180_v27 = vpop.f32.mrf.mxu0 }
 0x109   :  { %v181_v28 = vadd.f32 %v384_v26, %v180_v27 }
 0x10a   :  { %v425_v29 = vpop.f32.mrf.mxu0 }
 0x10b   :  { %v184_v30 = vmax.f32 %v181_v28, 0.0 }
 0x10d   :  { %466 = vmatmul.mubr.f32.vlgmr.msra.gmra.mxu1 %v184_v30 }
 0x10e   :  { %v274_v31 = vpop.f32.mrf.mxu0 }
 0x110   :  { %v432_v32 = vpop.f32.mrf.mxu0 }
 0x1cd   :  { %v344_v33 = vpop.f32.mrf.mxu1 }
 0x1ce   :  { %v345_v35 = vadd.f32 %v344_v33, %v274_v31 }
 0x1cf   :  { %v467_v36 = vpop.f32.mrf.mxu1 }
 0x1d0   :  { %v355_v37 = vadd.f32 %v387_v34, %v345_v35 }
 0x1d2   :  { %v356_v39 = vmax.f32 %v355_v37, 0.0 }
 0x1d4   :  { %v364_v40 = vmul.f32 %v388_v38, %v356_v39 }
 0x1d6   :  { %365 = vadd.xlane.f32.xlu0 %v364_v40 }
 0x25f   :  { %v366_v42 = vpop.xlane.xlu0 %365 }
 0x260   :  { %v374_v43 = vadd.f32 %v389_v41, %v366_v42 }
 0x262   :  { %376 = vst.msk [vmem:[%s718_s9] sm:$0xff] %vm375_vm3, %v374_v43 }
 0x263   :  { %381 = vsyncpa [#allocation4], 1 }
 0x264   :  { %382 = vsyncpa [#allocation6], 1 }
 0x265   :  { %383 = vsyncpa [#allocation9], 1 }

</bundles_post_ra>
